<compile_context>
chip_gen: v7x
topology: tpu7x:2x2x1
jax: 0.10.0
libtpu: 0.0.40
codegen_flags: <defaults>
</compile_context>

<pallas_src>
import functools

import jax
import jax.numpy as jnp
from jax import lax
from jax.experimental import pallas as pl
from jax.experimental.pallas import tpu as pltpu

block_size = 8
n_embed = 32
head_size = 16


def head_kernel(x_ref, w_ref, o_ref, *, batch, seq, hdim):
    # x_ref: (B*T, C)   all batch rows, flattened
    # w_ref: (C, 3H)    [W_key | W_query | W_value] fused
    # o_ref: (B*T, H)
    x = x_ref[...].astype(jnp.float32)          # (B*T, C)
    w = w_ref[...].astype(jnp.float32)          # (C, 3H)

    # Single fused QKV projection for all batch rows (one MXU pass).
    qkv = jnp.dot(x, w, preferred_element_type=jnp.float32)   # (B*T, 3H)

    C = x.shape[-1]
    scale = C ** (-0.5)   # matches PyTorch module: scales by n_embed**-0.5

    # Causal mask (shared across batch elements).
    row = lax.broadcasted_iota(jnp.int32, (seq, seq), 0)
    col = lax.broadcasted_iota(jnp.int32, (seq, seq), 1)
    causal = row >= col

    # Static unroll over batch (B=2): stays inside one kernel invocation, so
    # there is no per-grid-step pipeline overhead. All slices are static.
    for b in range(batch):
        r0 = b * seq
        k_b = qkv[r0:r0 + seq, 0 * hdim:1 * hdim]   # (T, H)
        q_b = qkv[r0:r0 + seq, 1 * hdim:2 * hdim]   # (T, H)
        v_b = qkv[r0:r0 + seq, 2 * hdim:3 * hdim]   # (T, H)

        # q @ k^T without materializing k.T: contract H axis of both operands.
        wei = lax.dot_general(
            q_b, k_b,
            dimension_numbers=(((1,), (1,)), ((), ())),
            preferred_element_type=jnp.float32,
        ) * scale                                    # (T, T)

        # Large finite negative instead of -inf (NaN-propagation hardening).
        wei = jnp.where(causal, wei, -1e30)

        # Numerically stable softmax over the last dim.
        wei = wei - jnp.max(wei, axis=-1, keepdims=True)
        p = jnp.exp(wei)
        denom = jnp.sum(p, axis=-1, keepdims=True)
        attn = p * pl.reciprocal(denom, approx=True)  # EUP vrcp slot (co-issues)

        out_b = jnp.dot(attn, v_b, preferred_element_type=jnp.float32)  # (T, H)
        o_ref[r0:r0 + seq, :] = out_b.astype(o_ref.dtype)

    # TODO(synk): in full-model use, fuse all heads (and batch) into one
    # pallas_call with output last dim = n_heads*H >= 128 for unmasked vst.


def head_forward(x, w_key, w_query, w_value):
    """x: (B, T, C) float32; w_*: (C, H) (pre-transposed Linear weights).

    Returns (B, T, H), matching Head.forward in eval mode.
    """
    B, T, C = x.shape
    H = w_key.shape[1]

    # Fuse the three projection weights -> one matmul, one weight DMA.
    w_qkv = jnp.concatenate([w_key, w_query, w_value], axis=1)   # (C, 3H)
    x_flat = x.reshape(B * T, C)                                  # (B*T, C)

    kernel = functools.partial(head_kernel, batch=B, seq=T, hdim=H)

    out_flat = pl.pallas_call(
        kernel,
        out_shape=jax.ShapeDtypeStruct((B * T, H), x.dtype),
        grid_spec=pltpu.PrefetchScalarGridSpec(
            num_scalar_prefetch=0,
            grid=(1,),                                   # single invocation
            in_specs=[
                pl.BlockSpec((B * T, C), lambda i: (0, 0)),     # x (flattened)
                pl.BlockSpec((C, 3 * H), lambda i: (0, 0)),     # fused W_qkv
            ],
            out_specs=pl.BlockSpec((B * T, H), lambda i: (0, 0)),
        ),
        compiler_params=pltpu.CompilerParams(
            dimension_semantics=("arbitrary",),   # 1 step: megacore sharding useless
        ),
    )(x_flat, w_qkv)

    return out_flat.reshape(B, T, H)


def reference_forward(x, w_key, w_query, w_value):
    """Pure-JAX reference matching the PyTorch module (eval mode)."""
    B, T, C = x.shape
    k = x @ w_key
    q = x @ w_query
    v = x @ w_value
    wei = (q @ jnp.swapaxes(k, -2, -1)) * (C ** -0.5)
    tril = jnp.tril(jnp.ones((T, T)))
    wei = jnp.where(tril == 0, -jnp.inf, wei)
    wei = jax.nn.softmax(wei, axis=-1)
    return wei @ v


if __name__ == "__main__":
    key = jax.random.PRNGKey(0)
    kx, kk, kq, kv = jax.random.split(key, 4)

    B, T, C, H = 2, block_size, n_embed, head_size

    x = jax.random.normal(kx, (B, T, C), dtype=jnp.float32)
    # nn.Linear(n_embed, head_size, bias=False): weight is (H, C); store W.T = (C, H)
    bound = 1.0 / (C ** 0.5)
    w_key = jax.random.uniform(kk, (C, H), jnp.float32, -bound, bound)
    w_query = jax.random.uniform(kq, (C, H), jnp.float32, -bound, bound)
    w_value = jax.random.uniform(kv, (C, H), jnp.float32, -bound, bound)

    out = head_forward(x, w_key, w_query, w_value)
    out = jax.block_until_ready(out)

    ref = reference_forward(x, w_key, w_query, w_value)
    assert out.shape == (B, T, H)
    # Tolerance relaxed for approx reciprocal (EUP vrcp, ~1e-3 relative).
    assert jnp.allclose(out, ref, atol=5e-3, rtol=5e-3), "mismatch vs reference"

    print("KERNEL_OK")
</pallas_src>

<mosaic_0001>
module attributes {stable_mosaic.version = 11 : i64} {
  func.func @head_kernel(%arg0: i32, %arg1: memref<16x32xf32, #tpu.memory_space<vmem>>, %arg2: memref<32x48xf32, #tpu.memory_space<vmem>>, %arg3: memref<16x16xf32, #tpu.memory_space<vmem>>) attributes {dimension_semantics = [#tpu.dimension_semantics<arbitrary>], iteration_bounds = array<i64: 1>, scalar_prefetch = 0 : i64, scratch_operands = 0 : i64, tpu.core_type = #tpu.core_type<tc>, window_params = [{pipeline_mode = #tpu.pipeline_mode<synchronous>, transform_indices = @transform_0, window_bounds = array<i64: 16, 32>}, {pipeline_mode = #tpu.pipeline_mode<synchronous>, transform_indices = @transform_1, window_bounds = array<i64: 32, 48>}, {pipeline_mode = #tpu.pipeline_mode<synchronous>, transform_indices = @transform_2, window_bounds = array<i64: 16, 16>}]} {
    %c0 = arith.constant 0 : index
    %c0_0 = arith.constant 0 : index
    %0 = vector.load %arg1[%c0, %c0_0] : memref<16x32xf32, #tpu.memory_space<vmem>>, vector<16x32xf32>
    %c0_1 = arith.constant 0 : index
    %c0_2 = arith.constant 0 : index
    %1 = vector.load %arg2[%c0_1, %c0_2] : memref<32x48xf32, #tpu.memory_space<vmem>>, vector<32x48xf32>
    %cst = arith.constant dense<0.000000e+00> : vector<16x48xf32>
    %2 = tpu.matmul %0, %1, %cst {dimension_numbers = #tpu.dot_dimension_numbers<[1], [0], [0], [1], [0, 0, 1, 1], [], []>} : vector<16x32xf32>, vector<32x48xf32>, vector<16x48xf32> -> vector<16x48xf32>
    %3 = tpu.iota {dimensions = array<i32: 0>} : vector<8x8xi32>
    %4 = tpu.iota {dimensions = array<i32: 1>} : vector<8x8xi32>
    %5 = arith.cmpi sge, %3, %4 : vector<8x8xi32>
    %6 = vector.extract_strided_slice %2 {offsets = [0, 0], sizes = [8, 16], strides = [1, 1]} : vector<16x48xf32> to vector<8x16xf32>
    %7 = vector.extract_strided_slice %2 {offsets = [0, 16], sizes = [8, 16], strides = [1, 1]} : vector<16x48xf32> to vector<8x16xf32>
    %8 = vector.extract_strided_slice %2 {offsets = [0, 32], sizes = [8, 16], strides = [1, 1]} : vector<16x48xf32> to vector<8x16xf32>
    %cst_3 = arith.constant dense<0.000000e+00> : vector<8x8xf32>
    %9 = tpu.matmul %7, %6, %cst_3 {dimension_numbers = #tpu.dot_dimension_numbers<[1], [1], [0], [0], [0, 0, 1, 0], [], []>} : vector<8x16xf32>, vector<8x16xf32>, vector<8x8xf32> -> vector<8x8xf32>
    %cst_4 = arith.constant 0.176776692 : f32
    %10 = vector.broadcast %cst_4 : f32 to vector<8x8xf32>
    %11 = arith.mulf %9, %10 : vector<8x8xf32>
    %cst_5 = arith.constant -1.000000e+30 : f32
    %12 = vector.broadcast %cst_5 : f32 to vector<8x8xf32>
    %13 = arith.select %5, %11, %12 : vector<8x8xi1>, vector<8x8xf32>
    %cst_6 = arith.constant dense<0xFF800000> : vector<8xf32>
    %14 = vector.multi_reduction <maximumf>, %13, %cst_6 [1] : vector<8x8xf32> to vector<8xf32>
    %15 = vector.shape_cast %14 : vector<8xf32> to vector<8x1xf32>
    %16 = vector.broadcast %15 : vector<8x1xf32> to vector<8x8xf32>
    %17 = arith.subf %13, %16 : vector<8x8xf32>
    %18 = math.exp %17 : vector<8x8xf32>
    %cst_7 = arith.constant dense<0.000000e+00> : vector<8xf32>
    %19 = vector.multi_reduction <add>, %18, %cst_7 [1] : vector<8x8xf32> to vector<8xf32>
    %20 = vector.shape_cast %19 : vector<8xf32> to vector<8x1xf32>
    %21 = tpu.reciprocal %20 {approx = true} : vector<8x1xf32> -> vector<8x1xf32>
    %22 = vector.broadcast %21 : vector<8x1xf32> to vector<8x8xf32>
    %23 = arith.mulf %18, %22 : vector<8x8xf32>
    %cst_8 = arith.constant dense<0.000000e+00> : vector<8x16xf32>
    %24 = tpu.matmul %23, %8, %cst_8 {dimension_numbers = #tpu.dot_dimension_numbers<[1], [0], [0], [1], [0, 0, 1, 1], [], []>} : vector<8x8xf32>, vector<8x16xf32>, vector<8x16xf32> -> vector<8x16xf32>
    %c0_9 = arith.constant 0 : index
    %c0_10 = arith.constant 0 : index
    %25 = vector.load %arg3[%c0_9, %c0_10] : memref<16x16xf32, #tpu.memory_space<vmem>>, vector<8x16xf32>
    tpu.vector_store %arg3[%c0_9, %c0_10], %24 {strides = array<i32>} : memref<16x16xf32, #tpu.memory_space<vmem>>, vector<8x16xf32>,
    %26 = vector.extract_strided_slice %2 {offsets = [8, 0], sizes = [8, 16], strides = [1, 1]} : vector<16x48xf32> to vector<8x16xf32>
    %27 = vector.extract_strided_slice %2 {offsets = [8, 16], sizes = [8, 16], strides = [1, 1]} : vector<16x48xf32> to vector<8x16xf32>
    %28 = vector.extract_strided_slice %2 {offsets = [8, 32], sizes = [8, 16], strides = [1, 1]} : vector<16x48xf32> to vector<8x16xf32>
    %cst_11 = arith.constant dense<0.000000e+00> : vector<8x8xf32>
    %29 = tpu.matmul %27, %26, %cst_11 {dimension_numbers = #tpu.dot_dimension_numbers<[1], [1], [0], [0], [0, 0, 1, 0], [], []>} : vector<8x16xf32>, vector<8x16xf32>, vector<8x8xf32> -> vector<8x8xf32>
    %cst_12 = arith.constant 0.176776692 : f32
    %30 = vector.broadcast %cst_12 : f32 to vector<8x8xf32>
    %31 = arith.mulf %29, %30 : vector<8x8xf32>
    %cst_13 = arith.constant -1.000000e+30 : f32
    %32 = vector.broadcast %cst_13 : f32 to vector<8x8xf32>
    %33 = arith.select %5, %31, %32 : vector<8x8xi1>, vector<8x8xf32>
    %cst_14 = arith.constant dense<0xFF800000> : vector<8xf32>
    %34 = vector.multi_reduction <maximumf>, %33, %cst_14 [1] : vector<8x8xf32> to vector<8xf32>
    %35 = vector.shape_cast %34 : vector<8xf32> to vector<8x1xf32>
    %36 = vector.broadcast %35 : vector<8x1xf32> to vector<8x8xf32>
    %37 = arith.subf %33, %36 : vector<8x8xf32>
    %38 = math.exp %37 : vector<8x8xf32>
    %cst_15 = arith.constant dense<0.000000e+00> : vector<8xf32>
    %39 = vector.multi_reduction <add>, %38, %cst_15 [1] : vector<8x8xf32> to vector<8xf32>
    %40 = vector.shape_cast %39 : vector<8xf32> to vector<8x1xf32>
    %41 = tpu.reciprocal %40 {approx = true} : vector<8x1xf32> -> vector<8x1xf32>
    %42 = vector.broadcast %41 : vector<8x1xf32> to vector<8x8xf32>
    %43 = arith.mulf %38, %42 : vector<8x8xf32>
    %cst_16 = arith.constant dense<0.000000e+00> : vector<8x16xf32>
    %44 = tpu.matmul %43, %28, %cst_16 {dimension_numbers = #tpu.dot_dimension_numbers<[1], [0], [0], [1], [0, 0, 1, 1], [], []>} : vector<8x8xf32>, vector<8x16xf32>, vector<8x16xf32> -> vector<8x16xf32>
    %c8 = arith.constant 8 : index
    %c0_17 = arith.constant 0 : index
    %45 = vector.load %arg3[%c8, %c0_17] : memref<16x16xf32, #tpu.memory_space<vmem>>, vector<8x16xf32>
    tpu.vector_store %arg3[%c8, %c0_17], %44 {strides = array<i32>} : memref<16x16xf32, #tpu.memory_space<vmem>>, vector<8x16xf32>,
    return
  }
  func.func @transform_0(%arg0: i32) -> (i32, i32) {
    %c0_i32 = arith.constant 0 : i32
    %c0_i32_0 = arith.constant 0 : i32
    %c0_i32_1 = arith.constant 0 : i32
    return %c0_i32, %c0_i32_0 : i32, i32
  }
  func.func @transform_1(%arg0: i32) -> (i32, i32) {
    %c0_i32 = arith.constant 0 : i32
    %c0_i32_0 = arith.constant 0 : i32
    %c0_i32_1 = arith.constant 0 : i32
    return %c0_i32, %c0_i32_0 : i32, i32
  }
  func.func @transform_2(%arg0: i32) -> (i32, i32) {
    %c0_i32 = arith.constant 0 : i32
    %c0_i32_0 = arith.constant 0 : i32
    %c0_i32_1 = arith.constant 0 : i32
    return %c0_i32, %c0_i32_0 : i32, i32
  }
}

</mosaic_0001>

<bundles_post_ra>
// kernel: tpu_custom_call.1
= control target key start
LH: loop header
LB: loop body
LE: loop exit
PB: predicated region body
PF: predicated region fallthrough
CT: control target
= control target key end

     0   :  { %7 = vsyncpa [#allocation3], 0  ;;  %s730_s0 = inlined_call_operand.hbm [shape: f32[16,32], index: 0, kind: input, shape index: {}]   ;;  %s731_s1 = inlined_call_operand.hbm [shape: f32[32,48], index: 1, kind: input, shape index: {}]   ;;  %s732_s2 = inlined_call_operand.hbm [shape: f32[16,16], index: 2, kind: output, shape index: {}]  }
   0x1   :  { %8 = vsyncpa [#allocation6], 0 }
   0x2   :  { %9 = vsyncpa [#allocation4], 0  ;;  %s637_s9 = smov [#allocation2]   ;;  %s565_s13 = scalar_lea.hbm %s730_s0, 256 }
   0x3   :  { %s15_s10 = sshll.u32 %s637_s9, 4  ;;  %p566_p0 = scmp.ne.s32.totalorder %s730_s0, %s565_s13  ;;  %s16_s10 = int_to_ptr.vmem [resolvable:$true] %s15_s10 }
   0x4   :  { %p569_p1 = scmp.lt.u32.totalorder %s565_s13, %s730_s0 }
   0x6   :  { %p571_p2 = pnand %p569_p1, %p566_p0 }
   0x8   :  { %574 = shalt.err (!%p571_p2)
}
   0x9   :  { %s575_s18 = scalar_lea.vmem %s16_s10, 256  ;;  %p580_p4 = scmp.lt.s32.totalorder %s16_s10, %s16_s10 }
   0xa   :  { %p576_p3 = scmp.ne.s32.totalorder %s16_s10, %s575_s18  ;;  %p581_p5 = scmp.lt.s32.totalorder %s575_s18, %s575_s18 }
   0xc   :  { %p582_p6 = por %p581_p5, %p580_p4 }
   0xe   :  { %p583_p7 = pnand %p582_p6, %p576_p3 }
  0x10   :  { %586 = shalt.err (!%p583_p7)
}
  0x11   :  { %s638_s19 = smov 128   ;;  %s639_s20 = smov 8  }
  0x12   :  { %21 = dma.hbm_to_vmem [thread:$0]  %s730_s0, 256, %s16_s10, [#allocation3], %s638_s19, %s638_s19, %s639_s20  }
  0x13   :  { %s640_s23 = smov [#allocation5]   ;;  %s587_s27 = scalar_lea.hbm %s731_s1, 512 }
  0x14   :  { %s27_s24 = sshll.u32 %s640_s23, 4  ;;  %p588_p8 = scmp.ne.s32.totalorder %s731_s1, %s587_s27  ;;  %s28_s24 = int_to_ptr.vmem [resolvable:$true] %s27_s24 }
  0x15   :  { %p591_p9 = scmp.lt.u32.totalorder %s587_s27, %s731_s1 }
  0x17   :  { %p593_p10 = pnand %p591_p9, %p588_p8 }
  0x19   :  { %596 = shalt.err (!%p593_p10)
}
  0x1a   :  { %s597_s4 = scalar_lea.vmem %s28_s24, 512  ;;  %p602_p12 = scmp.lt.s32.totalorder %s28_s24, %s28_s24 }
  0x1b   :  { %p598_p11 = scmp.ne.s32.totalorder %s28_s24, %s597_s4  ;;  %p603_p13 = scmp.lt.s32.totalorder %s597_s4, %s597_s4 }
  0x1d   :  { %p604_p0 = por %p603_p13, %p602_p12 }
  0x1f   :  { %p605_p1 = pnand %p604_p0, %p598_p11 }
  0x21   :  { %608 = shalt.err (!%p605_p1)
}
  0x22   :  { %33 = dma.hbm_to_vmem [thread:$0]  %s731_s1, 512, %s28_s24, [#allocation6], %s638_s19, %s638_s19, %s639_s20  }
  0x23   :  { %631 = dma.done.wait [#allocation3], 256  }
  0x24   :  { %632 = vsyncadd [#allocation3], 4294967040 }
  0x25   :  { %633 = dma.done.wait [#allocation6], 512  }
  0x26   :  { %634 = vsyncadd [#allocation6], 4294966784  ;;  %vm46_vm0 = vcmask 261120   ;;  %v42_v0 = vld [vmem:[#allocation5] sm:$0xff]  ;;  %v43_v1 = vld [vmem:[#allocation5 + $0x8] sm:$0xff]  ;;  %v641_v8 = vmov 0.0   ;;  %v128_v13 = vlaneseq }
  0x27   :  { %v44_v2 = vld [vmem:[#allocation5 + $0x10] sm:$0xff]  ;;  %v540_v3 = vpack.c.bf16 %v43_v1, %v42_v0  ;;  %v45_v4 = vld [vmem:[#allocation5 + $0x18] sm:$0xff]  ;;  %520 = vmatprep.subr.mxu1 %v641_v8  ;;  %vm642_vm1 = vmmov 0   ;;  %vm136_vm2 = vcmask 130048   ;;  %s643_s1 = smov 112   ;;  %vm213_vm4 = vcmask 64512  }
  0x28   :  { %v40_v5 = vld [vmem:[#allocation2] sm:$0xff]  ;;  %v544_v6 = vpack.c.bf16 %v45_v4, %v44_v2  ;;  %v41_v7 = vld [vmem:[#allocation2 + $0x8] sm:$0xff]  ;;  %522 = vmatprep.mubr.msk.f32.mxu1 %vm642_vm1, %v641_v8  ;;  %v129_v14 = vshrl.u32 %v128_v13, 7  ;;  %v131_v15 = vand.u32 127, %v128_v13  ;;  %s644_s6 = smov 96   ;;  %s645_s7 = smov [#allocation7]  }
  0x29   :  { %517 = vmatprep.mubr.msk.f32.mxu0 %vm46_vm0, %v40_v5  ;;  %541 = vmatprep.subr.bf16.mxu0 %v540_v3  ;;  %s474_s8 = sshll.u32 %s645_s7, 4  ;;  %s475_s8 = int_to_ptr.vmem [resolvable:$true] %s474_s8 }
  0x2a   :  { %543 = vmatpush3.bf16.msra.mxu0 %v540_v3  ;;  %vm132_vm3 = vcmp.ge.s32.totalorder %v129_v14, %v131_v15  ;;  %s609_s9 = scalar_lea.vmem %s475_s8, 256  ;;  %p614_p3 = scmp.lt.s32.totalorder %s475_s8, %s475_s8 }
  0x2b   :  { %545 = vmatprep.subr.bf16.mxu0 %v544_v6  ;;  %p610_p2 = scmp.ne.s32.totalorder %s475_s8, %s609_s9  ;;  %p615_p4 = scmp.lt.s32.totalorder %s609_s9, %s609_s9 }
  0x2d   :  { %p616_p5 = por %p615_p4, %p614_p3 }
  0x2e   :  { %547 = vmatpush3.bf16.msra.mxu0 %v544_v6 }
  0x2f   :  { %530 = vmatprep.subr.mxu0 %v641_v8  ;;  %p617_p6 = pnand %p616_p5, %p610_p2 }
  0x31   :  { %518 = vmatmul.mubr.msk.f32.vlgmr.msra.gmra.mrb[0].mxu0 %vm46_vm0, %v41_v7 }
  0x32   :  { %532 = vmatprep.mubr.msk.f32.mxu0 %vm642_vm1, %v641_v8 }
 0x104   :  { %v519_v9 = vpop.f32.mrb[0].mxu0 }
 0x105   :  { %v119_v10 = vpop.f32.mrb[1].mxu0  ;;  %531 = vmatpush3.xpose.msk.msra.mxu0 %vm136_vm2, %v519_v9 }
 0x106   :  { %134 = vrot.lane.b32.xlu0 %v119_v10, %s643_s1  ;;  %521 = vmatpush3.xpose.msk.msra.mxu1 %vm136_vm2, %v119_v10 }
 0x107   :  { %525 = vmatprep.subr.mxu1 %v641_v8 }
 0x10a   :  { %303 = vrot.lane.b32.xlu0 %v519_v9, %s643_s1 }
 0x178   :  { %v135_v11 = vpop.permute.xlu0 %134 }
 0x179   :  { %523 = vmatmul.mubr.msk.f32.vlgmr.msra.gmra.mrb[0].mxu1 %vm136_vm2, %v135_v11 }
 0x17a   :  { %527 = vmatprep.mubr.msk.f32.mxu1 %vm642_vm1, %v641_v8 }
 0x17c   :  { %v304_v12 = vpop.permute.xlu0 %303 }
 0x17d   :  { %533 = vmatmul.mubr.msk.f32.vlgmr.msra.gmra.mrb[2].mxu0 %vm136_vm2, %v304_v12 }
 0x24c   :  { %v207_v16 = vpop.f32.mrb[0].mxu1 }
 0x24d   :  { %v211_v17 = vmul.f32 0.17677669, %v207_v16  ;;  %v524_v18 = vpop.f32.mrb[1].mxu1 }
 0x24f   :  { %v212_v19 = vsel %vm132_vm3, %v211_v17, -1e+30 }
 0x250   :  { %v375_v20 = vpop.f32.mrb[2].mxu0  ;;  %v214_v21 = vsel %vm213_vm4, %v212_v19, -inf }
 0x251   :  { %v379_v22 = vmul.f32 0.17677669, %v375_v20  ;;  %v534_v23 = vpop.f32.mrb[3].mxu0  ;;  %215 = vmax.xlane.f32.xlu1 %v214_v21 }
 0x253   :  { %v380_v24 = vsel %vm132_vm3, %v379_v22, -1e+30 }
 0x254   :  { %v381_v25 = vsel %vm213_vm4, %v380_v24, -inf }
 0x255   :  { %382 = vmax.xlane.f32.xlu1 %v381_v25 }
 0x2de   :  { %v216_v26 = vpop.xlane.xlu1 %215 }
 0x2df   :  { %v217_v27 = vsub.f32 %v212_v19, %v216_v26 }
 0x2e1   :  { %v218_v28 = vmul.f32 1.442695, %v217_v27 }
 0x2e2   :  { %v383_v29 = vpop.xlane.xlu1 %382 }
 0x2e3   :  { %557 = vpow2.f32 %v218_v28  ;;  %v384_v30 = vsub.f32 %v380_v24, %v383_v29 }
 0x2e5   :  { %v385_v31 = vmul.f32 1.442695, %v384_v30 }
 0x2e7   :  { %559 = vpow2.f32 %v385_v31 }
 0x2ed   :  { %v558_v32 = vpop.eup %557 }
 0x2ee   :  { %v220_v33 = vsel %vm213_vm4, %v558_v32, 0.0 }
 0x2ef   :  { %221 = vadd.xlane.f32.xlu0 %v220_v33 }
 0x2f1   :  { %v560_v34 = vpop.eup %559 }
 0x2f2   :  { %v387_v35 = vsel %vm213_vm4, %v560_v34, 0.0 }
 0x2f3   :  { %388 = vadd.xlane.f32.xlu1 %v387_v35 }
 0x304   :  { %225 = vrot.lane.b32.xlu1 %v119_v10, %s644_s6 }
 0x308   :  { %392 = vrot.lane.b32.xlu1 %v519_v9, %s644_s6 }
 0x37c   :  { %v222_v36 = vpop.xlane.xlu0 %221 }
 0x37d   :  { %561 = vrcp.f32 %v222_v36 }
 0x380   :  { %v389_v37 = vpop.xlane.xlu1 %388 }
 0x381   :  { %563 = vrcp.f32 %v389_v37 }
 0x384   :  { %v226_v38 = vpop.permute.xlu1 %225 }
 0x385   :  { %526 = vmatpush3.msra.mxu1 %v226_v38 }
 0x386   :  { %535 = vmatprep.subr.mxu1 %v641_v8 }
 0x387   :  { %v562_v39 = vpop.eup %561 }
 0x388   :  { %v224_v40 = vmul.f32 %v562_v39, %v558_v32  ;;  %v393_v41 = vpop.permute.xlu1 %392 }
 0x38a   :  { %528 = vmatmul.mubr.msk.f32.vlgmr.msra.gmra.mrb[2].mxu1 %vm213_vm4, %v224_v40 }
 0x38b   :  { %v564_v42 = vpop.eup %563  ;;  %536 = vmatpush3.msra.mxu1 %v393_v41  ;;  %537 = vmatprep.mubr.msk.f32.mxu1 %vm642_vm1, %v641_v8 }
 0x38c   :  { %v391_v43 = vmul.f32 %v564_v42, %v560_v34 }
 0x38e   :  { %538 = vmatmul.mubr.msk.f32.vlgmr.msra.gmra.mrb[4].mxu1 %vm213_vm4, %v391_v43 }
 0x45d   :  { %v297_v44 = vpop.f32.mrb[2].mxu1 }
 0x45e   :  { %301 = vst.msk [vmem:[#allocation7] sm:$0xff] %vm136_vm2, %v297_v44  ;;  %v529_v45 = vpop.f32.mrb[3].mxu1 }
 0x461   :  { %v464_v46 = vpop.f32.mrb[4].mxu1 }
 0x462   :  { %468 = vst.msk [vmem:[#allocation7 + $0x8] sm:$0xff] %vm136_vm2, %v464_v46  ;;  %v539_v47 = vpop.f32.mrb[5].mxu1 }
 0x463   :  { %620 = shalt.err (!%p617_p6)
}
 0x464   :  { %s621_s12 = scalar_lea.hbm %s732_s2, 256 }
 0x465   :  { %p622_p7 = scmp.ne.s32.totalorder %s732_s2, %s621_s12  ;;  %p625_p8 = scmp.lt.u32.totalorder %s621_s12, %s732_s2 }
 0x467   :  { %p627_p9 = pnand %p625_p8, %p622_p7 }
 0x469   :  { %630 = shalt.err (!%p627_p9)
}
 0x46a   :  { %480 = dma.vmem_to_hbm [thread:$0]  %s475_s8, 256, %s732_s2, [#allocation4], %s638_s19, %s638_s19, %s639_s20  }
 0x46b   :  { %635 = dma.done.wait [#allocation4], 256  }
 0x46c   :  { %636 = vsyncadd [#allocation4], 4294967040 }
 0x46d   :  { %484 = vsyncpa [#allocation3], 1 }
 0x46e   :  { %485 = vsyncpa [#allocation6], 1 }
 0x46f   :  { %486 = vsyncpa [#allocation4], 1 }

</bundles_post_ra>
